<compile_context>
chip_gen: v6e
topology: v6e:2x2x1
jax: 0.10.0
libtpu: 0.0.40
codegen_flags: <defaults>
</compile_context>

<pallas_src>
import jax
import jax.numpy as jnp
from jax.experimental import pallas as pl
from jax.experimental.pallas import tpu as pltpu


def _gather_kernel(ids_ref, emb_ref, out_ref, buf_ref, sem):
    # ids_ref : SMEM (n_pad,) int32   (scalar-prefetch, whole array)
    # emb_ref : (V, D) table left in HBM (pl.ANY)
    # out_ref : VMEM (TILE, D) output tile
    # buf_ref : VMEM (TILE, D) gather scratch
    # sem     : single DMA semaphore shared by the TILE row copies
    tile = out_ref.shape[0]
    base = pl.program_id(0) * tile

    # Issue all row DMAs for this block; they are all in flight concurrently.
    @pl.loop(0, tile)
    def _issue(t):
        row = ids_ref[base + t]
        pltpu.make_async_copy(
            emb_ref.at[pl.ds(row, 1)],   # (1, D) row of the HBM table
            buf_ref.at[pl.ds(t, 1)],     # (1, D) row of the VMEM scratch
            sem,
        ).start()

    # Drain: each wait consumes one row-copy's completion (all copies share
    # the semaphore and have identical size), so after this loop every row
    # of buf_ref is valid.
    @pl.loop(0, tile)
    def _drain(t):
        pltpu.make_async_copy(
            emb_ref.at[pl.ds(0, 1)],
            buf_ref.at[pl.ds(t, 1)],
            sem,
        ).wait()

    # Single lane-dense store of the whole tile (unmasked vst).
    out_ref[...] = buf_ref[...]


def language_embedding(token_ids, emb_table, *, token_tile=256):
    """token_ids: (B, S) int ; emb_table: (V, D) -> (B, S, D) (gather rows)."""
    B, S = token_ids.shape
    V, D = emb_table.shape
    n_tok = B * S

    # OOB policy: clamp out-of-range ids (nn.Embedding raises; here we clamp
    # so a bad id never triggers an out-of-bounds HBM DMA).
    ids = jnp.clip(token_ids.reshape(-1).astype(jnp.int32), 0, V - 1)

    # Tile the token axis: large enough to amortize per-grid-step overhead,
    # but keep >= 2 grid steps when possible so v7x's 2nd TensorCore is used.
    tile = min(token_tile, max(8, pl.cdiv(n_tok, 2)))
    tile = ((tile + 7) // 8) * 8          # sublane (8) alignment for out tile
    n_blocks = pl.cdiv(n_tok, tile)
    n_pad = n_blocks * tile
    if n_pad != n_tok:
        ids = jnp.pad(ids, (0, n_pad - n_tok))   # padded tokens gather row 0

    out_flat = pl.pallas_call(
        _gather_kernel,
        out_shape=jax.ShapeDtypeStruct((n_pad, D), emb_table.dtype),
        grid_spec=pltpu.PrefetchScalarGridSpec(
            num_scalar_prefetch=1,                      # ids -> SMEM
            grid=(n_blocks,),
            in_specs=[
                pl.BlockSpec(memory_space=pl.ANY),      # table stays in HBM
            ],
            out_specs=pl.BlockSpec((tile, D), lambda i, ids: (i, 0)),
            scratch_shapes=[
                pltpu.VMEM((tile, D), emb_table.dtype),  # gather scratch
                pltpu.SemaphoreType.DMA,                 # shared DMA sem
            ],
        ),
        compiler_params=pltpu.CompilerParams(
            dimension_semantics=("parallel",),
        ),
    )(ids, emb_table)

    return out_flat[:n_tok].reshape(B, S, D)


def make_embedding_table(key, vocab_size, embed_dim, init_method="xavier"):
    """Deterministic re-implementation of the module's weight init."""
    if init_method == "xavier":
        bound = (6.0 / (vocab_size + embed_dim)) ** 0.5
        return jax.random.uniform(
            key, (vocab_size, embed_dim), jnp.float32, -bound, bound
        )
    elif init_method == "normal":
        return 0.02 * jax.random.normal(key, (vocab_size, embed_dim), jnp.float32)
    elif init_method == "uniform":
        return jax.random.uniform(
            key, (vocab_size, embed_dim), jnp.float32, -0.1, 0.1
        )
    elif init_method == "kaiming":
        # kaiming_uniform_ on an Embedding weight: fan_in = embed_dim (dim 1)
        bound = (6.0 / embed_dim) ** 0.5
        return jax.random.uniform(
            key, (vocab_size, embed_dim), jnp.float32, -bound, bound
        )
    else:
        raise ValueError(f"Invalid init_method: {init_method}")


# TODO(synk): module-level logging / tensor-stat logging is host-side only and
# has no kernel equivalent; it is intentionally omitted.

if __name__ == "__main__":
    vocab_size = 64
    embed_dim = 128
    batch, seq = 2, 8

    key = jax.random.PRNGKey(0)
    k_emb, k_ids = jax.random.split(key)

    emb_table = make_embedding_table(k_emb, vocab_size, embed_dim, "xavier")
    token_ids = jax.random.randint(k_ids, (batch, seq), 0, vocab_size, jnp.int32)

    out = language_embedding(token_ids, emb_table)
    out = jax.block_until_ready(out)

    # Reference check: plain gather (the DMA gather is exact by construction).
    ref = jnp.take(emb_table, token_ids, axis=0)
    assert out.shape == (batch, seq, embed_dim)
    assert jnp.allclose(out, ref), "mismatch vs. reference gather"

    print("KERNEL_OK")
</pallas_src>

<mosaic_0001>
module attributes {stable_mosaic.version = 11 : i64} {
  func.func @_gather_kernel(%arg0: i32, %arg1: memref<16xi32, #tpu.memory_space<smem>>, %arg2: memref<64x128xf32, #tpu.memory_space<any>>, %arg3: memref<8x128xf32, #tpu.memory_space<vmem>>, %arg4: memref<8x128xf32, #tpu.memory_space<vmem>>, %arg5: memref<!tpu.dma_semaphore, #tpu.memory_space<semaphore_mem>>) attributes {dimension_semantics = [#tpu.dimension_semantics<parallel>], iteration_bounds = array<i64: 2>, scalar_prefetch = 1 : i64, scratch_operands = 2 : i64, tpu.core_type = #tpu.core_type<tc>, window_params = [{}, {transform_indices = @transform_1, window_bounds = array<i64: 8, 128>}]} {
    %c8_i32 = arith.constant 8 : i32
    %0 = arith.muli %arg0, %c8_i32 : i32
    %c0_i32 = arith.constant 0 : i32
    %c8_i32_0 = arith.constant 8 : i32
    %1 = arith.addi %c0_i32, %c8_i32_0 : i32
    %c1_i32 = arith.constant 1 : i32
    scf.for %arg6 = %c0_i32 to %1 step %c1_i32  : i32 {
      %c1_i32_9 = arith.constant 1 : i32
      %5 = arith.muli %arg6, %c1_i32_9 : i32
      %c0_i32_10 = arith.constant 0 : i32
      %6 = arith.addi %c0_i32_10, %5 : i32
      %7 = arith.addi %0, %6 : i32
      %8 = arith.index_cast %7 : i32 to index
      %9 = memref.load %arg1[%8] : memref<16xi32, #tpu.memory_space<smem>>
      %c0_i32_11 = arith.constant 0 : i32
      %10 = tpu.memref_slice %arg2[%9, %c0_i32_11] : memref<64x128xf32, #tpu.memory_space<any>> -> memref<1x128xf32, #tpu.memory_space<any>>
      %c0_i32_12 = arith.constant 0 : i32
      %11 = tpu.memref_slice %arg4[%6, %c0_i32_12] : memref<8x128xf32, #tpu.memory_space<vmem>> -> memref<1x128xf32, #tpu.memory_space<vmem>>
      tpu.enqueue_dma source(%10 : memref<1x128xf32, #tpu.memory_space<any>>) target(%11 : memref<1x128xf32, #tpu.memory_space<vmem>>) target_semaphore(%arg5 : memref<!tpu.dma_semaphore, #tpu.memory_space<semaphore_mem>>)
    }
    %c8_i32_1 = arith.constant 8 : i32
    %c0_i32_2 = arith.constant 0 : i32
    %c8_i32_3 = arith.constant 8 : i32
    %2 = arith.addi %c0_i32_2, %c8_i32_3 : i32
    %c1_i32_4 = arith.constant 1 : i32
    scf.for %arg6 = %c0_i32_2 to %2 step %c1_i32_4  : i32 {
      %c1_i32_9 = arith.constant 1 : i32
      %5 = arith.muli %arg6, %c1_i32_9 : i32
      %c0_i32_10 = arith.constant 0 : i32
      %6 = arith.addi %c0_i32_10, %5 : i32
      %c0_i32_11 = arith.constant 0 : i32
      %c0_i32_12 = arith.constant 0 : i32
      %7 = tpu.memref_slice %arg2[%c0_i32_11, %c0_i32_12] : memref<64x128xf32, #tpu.memory_space<any>> -> memref<1x128xf32, #tpu.memory_space<any>>
      %c0_i32_13 = arith.constant 0 : i32
      %8 = tpu.memref_slice %arg4[%6, %c0_i32_13] : memref<8x128xf32, #tpu.memory_space<vmem>> -> memref<1x128xf32, #tpu.memory_space<vmem>>
      tpu.wait_dma2 semaphore(%arg5 : memref<!tpu.dma_semaphore, #tpu.memory_space<semaphore_mem>>) src(%7 : memref<1x128xf32, #tpu.memory_space<any>>) dst(%8 : memref<1x128xf32, #tpu.memory_space<vmem>>)
    }
    %c8_i32_5 = arith.constant 8 : i32
    %c0 = arith.constant 0 : index
    %c0_6 = arith.constant 0 : index
    %3 = vector.load %arg4[%c0, %c0_6] : memref<8x128xf32, #tpu.memory_space<vmem>>, vector<8x128xf32>
    %c0_7 = arith.constant 0 : index
    %c0_8 = arith.constant 0 : index
    %4 = vector.load %arg3[%c0_7, %c0_8] : memref<8x128xf32, #tpu.memory_space<vmem>>, vector<8x128xf32>
    tpu.vector_store %arg3[%c0_7, %c0_8], %3 {strides = array<i32>} : memref<8x128xf32, #tpu.memory_space<vmem>>, vector<8x128xf32>,
    return
  }
  func.func @transform_1(%arg0: i32, %arg1: memref<16xi32, #tpu.memory_space<smem>>) -> (i32, i32) {
    %c0_i32 = arith.constant 0 : i32
    %c0_i32_0 = arith.constant 0 : i32
    return %arg0, %c0_i32 : i32, i32
  }
}

</mosaic_0001>

<bundles_post_ra>
// kernel: tpu_custom_call.1
= control target key start
LH: loop header
LB: loop body
LE: loop exit
PB: predicated region body
PF: predicated region fallthrough
CT: control target
= control target key end

     0   :  { %s325_s9 = smov [#allocation5]   ;;  %s447_s0 = inlined_call_operand.hbm [shape: s32[16], index: 0, kind: input, shape index: {}]   ;;  %s448_s1 = inlined_call_operand.hbm [shape: f32[64,128], index: 1, kind: input, shape index: {}]   ;;  %s449_s2 = inlined_call_operand.hbm [shape: f32[16,128], index: 2, kind: output, shape index: {}]  }
   0x1   :  { %8 = dma.hbm_to_smem %s447_s0, 16, %s325_s9, [#allocation4] }
   0x2   :  { %297 = dma.done.wait [#allocation4], 16 }
   0x3   :  { %298 = vsyncadd [#allocation4], 4294967280 }
   0x4   :  { %10 = sfence }
   0x5   :  { %11 = vsyncpa [#allocation7], 0 }
   0x6   :  { %13 = vsyncpa [#allocation7 + $0x1], 0  ;;  %s346_s12 = smov 0   ;;  %s348_s13 = smov 0  }
   0x7   :  { %s350_s14 = smov 0  }
   0x8 LB: > { %s162_s0 = sadd.s32 4294967295, %s315_s14   ;;  %s363_s15 = sadd.s32 1, %s315_s14   ;;  %s315_s14 = sphi %s350_s14, %s454_s14   ;;  %s311_s13 = sphi %s348_s13, %s453_s13   ;;  %s307_s12 = sphi %s346_s12, %s452_s12  }
   0x9   : > { %s22_s16 = ssub.s32 %s315_s14, %s363_s15  ;;  %s25_s17 = sadd.s32 1, %s311_s13 }
   0xa   : > { %p23_p0 = scmp.eq.s32.totalorder %s22_s16, 0  ;;  %p163_p1 = scmp.ne.s32.totalorder %s22_s16, 0 }
   0xb   : > { %p29_p2 = scmp.eq.s32.totalorder %s315_s14, 1  ;;  %p34_p3 = scmp.ne.s32.totalorder %s311_s13, %s307_s12 }
   0xc   : > { %s372_s18 = scalar_select %p23_p0, %s311_s13, %s25_s17  }
   0xd   : > { %p374_p4 = por %p163_p1, %p29_p2  ;;  %p35_p5 = scmp.eq.s32.totalorder %s162_s0, 1 }
   0xe   : > { %p164_p7 = scmp.ge.s32.totalorder %s315_s14, 2 }
   0xf   : > { %p378_p6 = por %p35_p5, %p34_p3  ;;  %s49_s21 = sand.u32 (!%p164_p7), 1, %s311_s13  }
  0x10   : > { %44 = sbr.rel (%p164_p7) target bundleno = 84 (0x54), region = 12  ;;  %s166_s22 = sshll.u32 (!%p164_p7), %s315_s14, 3 }
  0x11   : > { %s387_s23 = sshll.u32 (!%p164_p7), %s49_s21, 3  ;;  %s390_s25 = smov (!%p164_p7), 0  }
  0x12   : > { %s51_s24 = scalar_lea.vmem (!%p164_p7), [#allocation6], %s387_s23 }
  0x15 LB: >> { %s59_s26 = sadd.s32 %s319_s25, %s166_s22  ;;  %s63_s28 = scalar_lea.vmem [#allocation2], %s319_s25  ;;  %s319_s25 = sphi %s390_s25, %s58_s25  }
  0x16   : >> { %s60_s27 = sld [smem:[#allocation5 + %s59_s26]]  ;;  %s71_s29 = sshll.u32 %s63_s28, 4  ;;  %s72_s29 = int_to_ptr.vmem [resolvable:$true] %s71_s29 }
  0x17   : >> { %s231_s9 = scalar_lea.hbm %s448_s1, 1024 }
  0x1c   : >> { %s167_s30 = sshll.u32 %s60_s27, 4 }
  0x1d   : >> { %s62_s5 = scalar_lea.hbm %s448_s1, %s167_s30 }
  0x1e   : >> { %s229_s6 = scalar_lea.hbm %s62_s5, 16  ;;  %p232_p9 = scmp.lt.s32.totalorder %s62_s5, %s448_s1 }
  0x1f   : >> { %p230_p8 = scmp.ne.s32.totalorder %s62_s5, %s229_s6  ;;  %p233_p10 = scmp.lt.s32.totalorder %s231_s9, %s229_s6 }
  0x21   : >> { %p234_p11 = por %p233_p10, %p232_p9 }
  0x23   : >> { %p235_p12 = pnand %p234_p11, %p230_p8 }
  0x25   : >> { %238 = shalt.err (!%p235_p12)  }
  0x26   : >> { %s239_s0 = scalar_lea.vmem %s72_s29, 16  ;;  %s326_s16 = smov [#allocation2]  }
  0x27   : >> { %p240_p13 = scmp.ne.s32.totalorder %s72_s29, %s239_s0  ;;  %s241_s17 = sshll.u32 %s326_s16, 4  ;;  %s242_s17 = int_to_ptr.vmem [resolvable:$false] %s241_s17 }
  0x28   : >> { %s243_s26 = scalar_lea.vmem %s242_s17, 128  ;;  %p244_p0 = scmp.lt.s32.totalorder %s72_s29, %s242_s17 }
  0x29   : >> { %p245_p1 = scmp.lt.s32.totalorder %s243_s26, %s239_s0 }
  0x2b   : >> { %p246_p2 = por %p245_p1, %p244_p0 }
  0x2d   : >> { %p247_p3 = pnand %p246_p2, %p240_p13 }
  0x2f   : >> { %250 = shalt.err (!%p247_p3)  }
  0x30   : >> { %74 = dma.hbm_to_vmem [thread:$0]  %s62_s5, 16, %s72_s29, [#allocation3] }
  0x31   : >> { %s58_s25 = sadd.s32 1, %s319_s25  }
  0x32   : >> { %p55_p5 = scmp.ge.s32.totalorder %s58_s25, 8  }
  0x33   : > { %s321_s27 = smov (%p55_p5), 0  }
  0x34   : > { %57 = sbr.rel (!%p55_p5) target bundleno = 21 (0x15), region = 64 }
  0x39 LB: >> { %299 = dma.done.wait [#allocation3], 16  ;;  %s323_s27 = sphi %s321_s27, %s80_s27  }
  0x3a   : >> { %300 = vsyncadd [#allocation3], 4294967280  ;;  %s80_s27 = sadd.s32 1, %s323_s27  }
  0x3b   : >> { %p77_p7 = scmp.ge.s32.totalorder %s80_s27, 8  }
  0x3c   : > { %v84_v0 = vld [vmem:[#allocation2] sm:$0xff] (%p77_p7)  ;;  %s169_s28 = sshll.u32 (%p77_p7), %s315_s14, 7  ;;  %s100_s30 = sshll.u32 (%p77_p7), %s51_s24, 4  ;;  %s101_s30 = int_to_ptr.vmem [resolvable:$true] %s100_s30 }
  0x3d   : > { %79 = sbr.rel (!%p77_p7) target bundleno = 57 (0x39), region = 75  ;;  %85 = vst [vmem:[%s51_s24] sm:$0xff] (%p77_p7), %v84_v0  ;;  %s98_s29 = scalar_lea.hbm (%p77_p7), %s449_s2, %s169_s28 }
  0x3e   : > { %s87_s3 = scalar_lea.sflag (%p77_p7), [#allocation7], %s49_s21  ;;  %s251_s4 = scalar_lea.vmem (%p77_p7), %s101_s30, 128 }
  0x3f   : > { %p252_p8 = scmp.ne.s32.totalorder (%p77_p7), %s101_s30, %s251_s4  ;;  %s327_s5 = smov (%p77_p7), [#allocation6]  }
  0x40   : > { %s255_s6 = sshll.u32 (%p77_p7), %s327_s5, 4  ;;  %s256_s6 = int_to_ptr.vmem [resolvable:$false] %s255_s6 }
  0x41   : > { %p253_p9 = pnand (%p77_p7), %p252_p8, %p374_p4  ;;  %s257_s7 = scalar_lea.vmem (%p77_p7), %s256_s6, 256 }
  0x42   : > { %p258_p11 = scmp.lt.s32.totalorder %s101_s30, %s256_s6  ;;  %p259_p12 = scmp.lt.s32.totalorder %s257_s7, %s251_s4 }
  0x43   : > { %p254_p10 = pneg %p253_p9 }
  0x44   : > { %p260_p13 = por %p259_p12, %p258_p11 }
  0x46   : > { %p261_p0 = pnand %p260_p13, %p254_p10 }
  0x48   : > { %264 = shalt.err (!%p261_p0)
}
  0x49   : > { %s265_s8 = scalar_lea.hbm %s98_s29, 128  ;;  %s269_s24 = scalar_lea.hbm %s449_s2, 256 }
  0x4a   : > { %p266_p1 = scmp.ne.s32.totalorder %s98_s29, %s265_s8  ;;  %p270_p5 = scmp.lt.s32.totalorder %s98_s29, %s449_s2 }
  0x4b   : > { %p271_p7 = scmp.lt.s32.totalorder %s269_s24, %s265_s8 }
  0x4c   : > { %p267_p2 = pnand %p266_p1, %p374_p4 }
  0x4d   : > { %p272_p8 = por %p271_p7, %p270_p5 }
  0x4e   : > { %p268_p3 = pneg %p267_p2 }
  0x50   : > { %p273_p9 = pnand %p272_p8, %p268_p3 }
  0x52   : > { %276 = shalt.err (!%p273_p9)
}
  0x53   : > { %173 = dma.vmem_to_hbm [thread:$0]  (%p374_p4), %s101_s30, 128, %s98_s29, %s87_s3  }
  0x54 PF: > { %p179_p10 = scmp.ge.s32.totalorder %s315_s14, 1  ;;  %s112_s11 = sand.u32 1, %s307_s12  }
  0x55   : > { %s113_s0 = scalar_lea.sflag [#allocation7], %s112_s11 }
  0x56   : > { %p176_p11 = pnand %p179_p10, %p378_p6 }
  0x58   : > { %p177_p12 = pneg %p176_p11 }
  0x5a   : > { %302 = dma.done.wait (%p177_p12), %s113_s0, 128  }
  0x5b   : > { %304 = vsyncadd (%p177_p12), %s113_s0, 4294967168  ;;  %p16_p13 = scmp.ge.s32.totalorder %s363_s15, 3   ;;  %s452_s12 = smov %s311_s13 }
  0x5c   : > { %s453_s13 = smov %s372_s18  ;;  %s454_s14 = smov %s363_s15 }
  0x5d   :  { %18 = sbr.rel (!%p16_p13) target bundleno = 8 (0x8), region = 86 }
  0x62   :  { %118 = vsyncpa [#allocation7], 1 }
  0x63   :  { %120 = vsyncpa [#allocation7 + $0x1], 1 }
  0x64   :  { %121 = vsyncmov [#allocation3] }
  0x67   :  { %s122_s14 = vpop.sfrf %121 }
  0x68   :  { %p172_p4 = scmp.ne.s32.totalorder %s122_s14, 0 }
  0x6a   :  { %126 = shalt.err (%p172_p4)  }

</bundles_post_ra>
